<compile_context>
chip_gen: v6e
topology: v6e:2x2x1
jax: 0.10.0
libtpu: 0.0.40
codegen_flags: <defaults>
</compile_context>

<pallas_src>
import functools

import jax
import jax.numpy as jnp
from jax import lax
from jax.experimental import pallas as pl
from jax.experimental.pallas import tpu as pltpu


def _round_up(x, m):
    return (x + m - 1) // m * m


def _default_grid_steps(n):
    """1 grid step on single-TC chips (v5e/v6e); 2 parallel steps on v7x so
    the megacore's two TensorCores both get work."""
    kind = ""
    try:
        kind = jax.devices()[0].device_kind.lower()
    except Exception:
        pass
    if ("v7" in kind or "tpu7" in kind or "7x" in kind) and n % 2 == 0 and n >= 2:
        return 2
    return 1


def _fused_head_kernel(x_ref, w1_ref, w2_ref, point_ref, offset_ref, wh_ref,
                       patches_ref, *, H, W, C):
    """Fused DetectHead for Nb images (one grid step).

    x_ref      : (Nb, C, H*W)   bf16  unpadded NCHW input, spatial on lanes
    w1_ref     : (M1, KP)       bf16  packed 3x3 conv weights (+ folded b1)
    w2_ref     : (5, M1)        bf16  packed block-diag 1x1 weights (+ folded b2)
    point_ref  : (Nb, 1, H*W)   f32
    offset_ref : (Nb, 2, H*W)   f32
    wh_ref     : (Nb, 2, H*W)   f32
    patches_ref: (KP, Nb*H*W)   bf16  VMEM scratch for the im2col patch matrix
    """
    HW = H * W
    Nb = x_ref.shape[0]
    L = Nb * HW
    K_taps = 9 * C
    KP = w1_ref.shape[1]

    # Lane-concatenate the Nb images of this step into one (C, L) slab.
    # Widen to f32 once (v5e has no bf16 VPU for the mask/select math below).
    xs = [x_ref[i].astype(jnp.float32) for i in range(Nb)]
    x = xs[0] if Nb == 1 else jnp.concatenate(xs, axis=1)            # (C, L)

    # Image-boundary masks, computed once at (1, L) and broadcast.
    pos = lax.broadcasted_iota(jnp.int32, (1, L), 1)
    ip = (pos & (HW - 1)) if (HW & (HW - 1)) == 0 else pos % HW      # pos within image
    col = (ip & (W - 1)) if (W & (W - 1)) == 0 else ip % W
    not_top = ip >= W                     # row >= 1      (needed when oy == -1)
    not_bot = ip < (H - 1) * W            # row <= H - 2  (needed when oy == +1)
    not_left = col >= 1                   # col >= 1      (needed when ox == -1)
    not_right = col <= W - 2              # col <= W - 2  (needed when ox == +1)

    # im2col: one lane-roll (XLU) + mask (VPU) per 3x3 tap, staged into the
    # bf16 VMEM scratch.  Rolls wrap across image boundaries inside the
    # lane-concatenated slab, but every wrapped position is an image-border
    # position and the masks above zero it out.
    t = 0
    for oy in (-1, 0, 1):
        for ox in (-1, 0, 1):
            s = oy * W + ox
            tap = x if s == 0 else pltpu.roll(x, shift=(-s) % L, axis=1)
            mask = None
            for cond, needed in ((not_top, oy == -1), (not_bot, oy == 1),
                                 (not_left, ox == -1), (not_right, ox == 1)):
                if needed:
                    mask = cond if mask is None else jnp.logical_and(mask, cond)
            if mask is not None:
                tap = jnp.where(mask, tap, 0.0)
            patches_ref[t * C:(t + 1) * C, :] = tap.astype(jnp.bfloat16)
            t += 1

    # Trailing rows: one constant-1 row (bias folding) + zero padding to KP.
    row = lax.broadcasted_iota(jnp.int32, (KP - K_taps, L), 0)
    patches_ref[K_taps:KP, :] = jnp.where(row == 0, 1.0, 0.0).astype(jnp.bfloat16)

    # 3x3 convs of all three branches (+ folded b1) as one MXU matmul, ReLU.
    hid = jnp.dot(w1_ref[...], patches_ref[...],
                  preferred_element_type=jnp.float32)                # (M1, L)
    hid = jnp.maximum(hid, 0.0)           # constant-1 row survives -> carries b2

    # 1x1 convs of all three branches (+ folded b2).
    y = jnp.dot(w2_ref[...], hid.astype(jnp.bfloat16),
                preferred_element_type=jnp.float32)                  # (5, L)

    # De-interleave per image and store the three lane-dense outputs.
    for i in range(Nb):
        yi = y[:, i * HW:(i + 1) * HW]
        point_ref[i] = yi[0:1]
        offset_ref[i] = yi[1:3]
        wh_ref[i] = yi[3:5]


def pack_detect_head_params(params, wide):
    """Pack the 3 branches into (W1_packed, W2_packed) in bf16.

    patches rows: [tap0 ch0..C-1, ..., tap8 ch0..C-1, ones, zero pad]  (KP rows)
    hid = relu(W1_packed @ patches)   rows: [point 0:C, offset C:2C,
                                             coordinate 2C:3C, ones 3C, zeros]
    y   = W2_packed @ hid             rows: [point, offset(2), wh(2)]
    Biases are folded via the constant-1 patches row / the constant-1 hid row.
    """
    C = wide
    K_taps = 9 * C
    KP = _round_up(K_taps + 1, 8)            # + ones row, padded to a sublane tile
    m_mid = 3 * C
    M1 = _round_up(m_mid + 1, 8)
    n_out = sum(params[b]["w2"].shape[-1] for b in ("point", "offset", "coordinate"))
    ones_col = K_taps                        # constant-1 row of patches
    ones_row = m_mid                         # constant-1 row of hid

    w1p = jnp.zeros((M1, KP), jnp.float32)
    w2p = jnp.zeros((n_out, M1), jnp.float32)
    row_mid = 0
    row_out = 0
    for name in ("point", "offset", "coordinate"):
        p = params[name]
        w1 = p["w1"]                         # (3, 3, C, C)  HWIO
        b1 = p["b1"].reshape(-1)             # (C,)
        w2 = p["w2"]                         # (C, out)
        b2 = p["b2"].reshape(-1)             # (out,)
        cmid = w1.shape[-1]
        ob = w2.shape[-1]
        w1_m = jnp.transpose(w1, (3, 0, 1, 2)).reshape(cmid, K_taps)   # tap-major K
        w1p = w1p.at[row_mid:row_mid + cmid, :K_taps].set(w1_m)
        w1p = w1p.at[row_mid:row_mid + cmid, ones_col].set(b1)          # fold b1
        w2p = w2p.at[row_out:row_out + ob, row_mid:row_mid + cmid].set(w2.T)
        w2p = w2p.at[row_out:row_out + ob, ones_row].set(b2)            # fold b2
        row_mid += cmid
        row_out += ob
    w1p = w1p.at[ones_row, ones_col].set(1.0)                           # ones generator
    return w1p.astype(jnp.bfloat16), w2p.astype(jnp.bfloat16)


def detect_head_forward(x_nchw, w1p, w2p, *, deploy=False, num_steps=None):
    """DetectHead.forward. Returns (point, offset, wh) in NCHW, or the
    deploy-mode (N*H*W, 5) concat when deploy=True."""
    N, C, H, W = x_nchw.shape
    HW = H * W
    if num_steps is None:
        num_steps = _default_grid_steps(N)
    if N % num_steps != 0:
        num_steps = 1
    Nb = N // num_steps
    KP = w1p.shape[1]

    # Unpadded, lane-dense, bf16 input: halves the per-step HBM->VMEM DMA.
    xr = x_nchw.reshape(N, C, HW).astype(jnp.bfloat16)

    kernel = functools.partial(_fused_head_kernel, H=H, W=W, C=C)
    point, offset, wh = pl.pallas_call(
        kernel,
        out_shape=(
            jax.ShapeDtypeStruct((N, 1, HW), jnp.float32),
            jax.ShapeDtypeStruct((N, 2, HW), jnp.float32),
            jax.ShapeDtypeStruct((N, 2, HW), jnp.float32),
        ),
        grid=(num_steps,),
        in_specs=[
            pl.BlockSpec((Nb, C, HW), lambda n: (n, 0, 0)),
            pl.BlockSpec(w1p.shape, lambda n: (0, 0)),
            pl.BlockSpec(w2p.shape, lambda n: (0, 0)),
        ],
        out_specs=(
            pl.BlockSpec((Nb, 1, HW), lambda n: (n, 0, 0)),
            pl.BlockSpec((Nb, 2, HW), lambda n: (n, 0, 0)),
            pl.BlockSpec((Nb, 2, HW), lambda n: (n, 0, 0)),
        ),
        scratch_shapes=[pltpu.VMEM((KP, Nb * HW), jnp.bfloat16)],
        compiler_params=pltpu.CompilerParams(
            dimension_semantics=("parallel",)),
    )(xr, w1p, w2p)

    point = point.reshape(N, 1, H, W)
    offset = offset.reshape(N, 2, H, W)
    wh = wh.reshape(N, 2, H, W)
    if deploy:
        # Deploy post-processing (sigmoid + permute/view/cat) is cheap layout
        # plumbing; kept as plain JAX wrapper ops rather than fused (its
        # (N*H*W, 5) layout would be lane-sparse inside the kernel).
        point = jax.nn.sigmoid(point)
        point = jnp.transpose(point, (0, 2, 3, 1)).reshape(-1, 1)
        offset = jnp.transpose(offset, (0, 2, 3, 1)).reshape(-1, 2)
        wh = jnp.transpose(wh, (0, 2, 3, 1)).reshape(-1, 2)
        return jnp.concatenate([point, offset, wh], axis=-1)
    return point, offset, wh


def init_branch_params(key, wide, out_feature):
    """Deterministic synthetic params for one branch (shapes follow nn.Conv2d)."""
    k1, k2, k3, k4 = jax.random.split(key, 4)
    b1_bound = 1.0 / float(wide * 9) ** 0.5
    b2_bound = 1.0 / float(wide) ** 0.5
    w1 = jax.random.uniform(k1, (3, 3, wide, wide), jnp.float32,
                            -b1_bound, b1_bound)                     # HWIO
    b1 = jax.random.uniform(k2, (wide,), jnp.float32, -b1_bound, b1_bound)
    w2 = jax.random.uniform(k3, (wide, out_feature), jnp.float32,
                            -b2_bound, b2_bound)
    b2 = jax.random.uniform(k4, (out_feature,), jnp.float32, -b2_bound, b2_bound)
    return dict(w1=w1, b1=b1, w2=w2, b2=b2)


def _ref_branch(x_nchw, p):
    """Pure-JAX f32 reference for one branch."""
    x = jnp.transpose(x_nchw, (0, 2, 3, 1)).astype(jnp.float32)
    y = lax.conv_general_dilated(
        x, p["w1"], window_strides=(1, 1), padding="SAME",
        dimension_numbers=("NHWC", "HWIO", "NHWC")) + p["b1"]
    y = jnp.maximum(y, 0.0)
    y = jnp.einsum("nhwc,co->nhwo", y, p["w2"]) + p["b2"]
    return jnp.transpose(y, (0, 3, 1, 2))


if __name__ == "__main__":
    N, wide, H, W = 2, 4, 16, 16

    key = jax.random.PRNGKey(0)
    kx, kp, ko, kc = jax.random.split(key, 4)
    x = jax.random.normal(kx, (N, wide, H, W), jnp.float32)         # NCHW

    params = {
        "point": init_branch_params(kp, wide, 1),
        "offset": init_branch_params(ko, wide, 2),
        "coordinate": init_branch_params(kc, wide, 2),
    }
    w1p, w2p = pack_detect_head_params(params, wide)

    fwd = jax.jit(detect_head_forward)
    point, offset, wh = fwd(x, w1p, w2p)
    jax.block_until_ready((point, offset, wh))

    # Shape checks (match PyTorch: N x out x H x W).
    assert point.shape == (N, 1, H, W)
    assert offset.shape == (N, 2, H, W)
    assert wh.shape == (N, 2, H, W)

    # Numerical check vs f32 reference (kernel uses bf16 matmul operands with
    # f32 accumulation, so tolerance is relaxed accordingly).
    ref_point = _ref_branch(x, params["point"])
    ref_offset = _ref_branch(x, params["offset"])
    ref_wh = _ref_branch(x, params["coordinate"])
    assert jnp.allclose(point, ref_point, atol=5e-2, rtol=5e-2), \
        float(jnp.max(jnp.abs(point - ref_point)))
    assert jnp.allclose(offset, ref_offset, atol=5e-2, rtol=5e-2), \
        float(jnp.max(jnp.abs(offset - ref_offset)))
    assert jnp.allclose(wh, ref_wh, atol=5e-2, rtol=5e-2), \
        float(jnp.max(jnp.abs(wh - ref_wh)))

    # deploy=True path (sigmoid + permute/view/cat), matching PyTorch output.
    fwd_deploy = jax.jit(functools.partial(detect_head_forward, deploy=True))
    dep = fwd_deploy(x, w1p, w2p)
    jax.block_until_ready(dep)
    assert dep.shape == (N * H * W, 5)
    ref_dep = jnp.concatenate([
        jax.nn.sigmoid(ref_point).transpose(0, 2, 3, 1).reshape(-1, 1),
        ref_offset.transpose(0, 2, 3, 1).reshape(-1, 2),
        ref_wh.transpose(0, 2, 3, 1).reshape(-1, 2)], axis=-1)
    assert jnp.allclose(dep, ref_dep, atol=5e-2, rtol=5e-2), \
        float(jnp.max(jnp.abs(dep - ref_dep)))

    print("KERNEL_OK")
</pallas_src>

<mosaic_0001>
module attributes {stable_mosaic.version = 11 : i64} {
  func.func @_fused_head_kernel(%arg0: i32, %arg1: memref<2x4x256xbf16, #tpu.memory_space<vmem>>, %arg2: memref<16x40xbf16, #tpu.memory_space<vmem>>, %arg3: memref<5x16xbf16, #tpu.memory_space<vmem>>, %arg4: memref<2x1x256xf32, #tpu.memory_space<vmem>>, %arg5: memref<2x2x256xf32, #tpu.memory_space<vmem>>, %arg6: memref<2x2x256xf32, #tpu.memory_space<vmem>>, %arg7: memref<40x512xbf16, #tpu.memory_space<vmem>>) attributes {dimension_semantics = [#tpu.dimension_semantics<parallel>], iteration_bounds = array<i64: 1>, scalar_prefetch = 0 : i64, scratch_operands = 1 : i64, tpu.core_type = #tpu.core_type<tc>, window_params = [{transform_indices = @transform_0, window_bounds = array<i64: 2, 4, 256>}, {pipeline_mode = #tpu.pipeline_mode<synchronous>, transform_indices = @transform_1, window_bounds = array<i64: 16, 40>}, {pipeline_mode = #tpu.pipeline_mode<synchronous>, transform_indices = @transform_2, window_bounds = array<i64: 5, 16>}, {transform_indices = @transform_3, window_bounds = array<i64: 2, 1, 256>}, {transform_indices = @transform_4, window_bounds = array<i64: 2, 2, 256>}, {transform_indices = @transform_5, window_bounds = array<i64: 2, 2, 256>}]} {
    %c0 = arith.constant 0 : index
    %c0_0 = arith.constant 0 : index
    %c0_1 = arith.constant 0 : index
    %0 = vector.load %arg1[%c0, %c0_0, %c0_1] : memref<2x4x256xbf16, #tpu.memory_space<vmem>>, vector<1x4x256xbf16>
    %1 = vector.shape_cast %0 : vector<1x4x256xbf16> to vector<4x256xbf16>
    %2 = arith.extf %1 : vector<4x256xbf16> to vector<4x256xf32>
    %c1 = arith.constant 1 : index
    %c0_2 = arith.constant 0 : index
    %c0_3 = arith.constant 0 : index
    %3 = vector.load %arg1[%c1, %c0_2, %c0_3] : memref<2x4x256xbf16, #tpu.memory_space<vmem>>, vector<1x4x256xbf16>
    %4 = vector.shape_cast %3 : vector<1x4x256xbf16> to vector<4x256xbf16>
    %5 = arith.extf %4 : vector<4x256xbf16> to vector<4x256xf32>
    %6 = tpu.concatenate %2, %5 in 1 : vector<4x256xf32>, vector<4x256xf32> -> vector<4x512xf32>
    %7 = tpu.iota {dimensions = array<i32: 1>} : vector<1x512xi32>
    %c255_i32 = arith.constant 255 : i32
    %8 = vector.broadcast %c255_i32 : i32 to vector<1x512xi32>
    %9 = arith.andi %7, %8 : vector<1x512xi32>
    %c15_i32 = arith.constant 15 : i32
    %10 = vector.broadcast %c15_i32 : i32 to vector<1x512xi32>
    %11 = arith.andi %9, %10 : vector<1x512xi32>
    %c16_i32 = arith.constant 16 : i32
    %12 = vector.broadcast %c16_i32 : i32 to vector<1x512xi32>
    %13 = arith.cmpi sge, %9, %12 : vector<1x512xi32>
    %c240_i32 = arith.constant 240 : i32
    %14 = vector.broadcast %c240_i32 : i32 to vector<1x512xi32>
    %15 = arith.cmpi slt, %9, %14 : vector<1x512xi32>
    %c1_i32 = arith.constant 1 : i32
    %16 = vector.broadcast %c1_i32 : i32 to vector<1x512xi32>
    %17 = arith.cmpi sge, %11, %16 : vector<1x512xi32>
    %c14_i32 = arith.constant 14 : i32
    %18 = vector.broadcast %c14_i32 : i32 to vector<1x512xi32>
    %19 = arith.cmpi sle, %11, %18 : vector<1x512xi32>
    %c17_i32 = arith.constant 17 : i32
    %20 = tpu.dynamic_rotate %6 by %c17_i32 dim 1 : vector<4x512xf32>, i32 -> vector<4x512xf32>
    %21 = arith.andi %13, %17 : vector<1x512xi1>
    %cst = arith.constant 0.000000e+00 : f32
    %22 = vector.shape_cast %21 : vector<1x512xi1> to vector<1x512xi1>
    %23 = vector.broadcast %22 : vector<1x512xi1> to vector<4x512xi1>
    %24 = vector.broadcast %cst : f32 to vector<4x512xf32>
    %25 = arith.select %23, %20, %24 : vector<4x512xi1>, vector<4x512xf32>
    %26 = arith.truncf %25 : vector<4x512xf32> to vector<4x512xbf16>
    %c0_4 = arith.constant 0 : index
    %c0_5 = arith.constant 0 : index
    %27 = vector.load %arg7[%c0_4, %c0_5] : memref<40x512xbf16, #tpu.memory_space<vmem>>, vector<4x512xbf16>
    tpu.vector_store %arg7[%c0_4, %c0_5], %26 {strides = array<i32>} : memref<40x512xbf16, #tpu.memory_space<vmem>>, vector<4x512xbf16>,
    %c16_i32_6 = arith.constant 16 : i32
    %28 = tpu.dynamic_rotate %6 by %c16_i32_6 dim 1 : vector<4x512xf32>, i32 -> vector<4x512xf32>
    %cst_7 = arith.constant 0.000000e+00 : f32
    %29 = vector.shape_cast %13 : vector<1x512xi1> to vector<1x512xi1>
    %30 = vector.broadcast %29 : vector<1x512xi1> to vector<4x512xi1>
    %31 = vector.broadcast %cst_7 : f32 to vector<4x512xf32>
    %32 = arith.select %30, %28, %31 : vector<4x512xi1>, vector<4x512xf32>
    %33 = arith.truncf %32 : vector<4x512xf32> to vector<4x512xbf16>
    %c4 = arith.constant 4 : index
    %c0_8 = arith.constant 0 : index
    %34 = vector.load %arg7[%c4, %c0_8] : memref<40x512xbf16, #tpu.memory_space<vmem>>, vector<4x512xbf16>
    tpu.vector_store %arg7[%c4, %c0_8], %33 {strides = array<i32>} : memref<40x512xbf16, #tpu.memory_space<vmem>>, vector<4x512xbf16>,
    %c15_i32_9 = arith.constant 15 : i32
    %35 = tpu.dynamic_rotate %6 by %c15_i32_9 dim 1 : vector<4x512xf32>, i32 -> vector<4x512xf32>
    %36 = arith.andi %13, %19 : vector<1x512xi1>
    %cst_10 = arith.constant 0.000000e+00 : f32
    %37 = vector.shape_cast %36 : vector<1x512xi1> to vector<1x512xi1>
    %38 = vector.broadcast %37 : vector<1x512xi1> to vector<4x512xi1>
    %39 = vector.broadcast %cst_10 : f32 to vector<4x512xf32>
    %40 = arith.select %38, %35, %39 : vector<4x512xi1>, vector<4x512xf32>
    %41 = arith.truncf %40 : vector<4x512xf32> to vector<4x512xbf16>
    %c8 = arith.constant 8 : index
    %c0_11 = arith.constant 0 : index
    %42 = vector.load %arg7[%c8, %c0_11] : memref<40x512xbf16, #tpu.memory_space<vmem>>, vector<4x512xbf16>
    tpu.vector_store %arg7[%c8, %c0_11], %41 {strides = array<i32>} : memref<40x512xbf16, #tpu.memory_space<vmem>>, vector<4x512xbf16>,
    %c1_i32_12 = arith.constant 1 : i32
    %43 = tpu.dynamic_rotate %6 by %c1_i32_12 dim 1 : vector<4x512xf32>, i32 -> vector<4x512xf32>
    %cst_13 = arith.constant 0.000000e+00 : f32
    %44 = vector.shape_cast %17 : vector<1x512xi1> to vector<1x512xi1>
    %45 = vector.broadcast %44 : vector<1x512xi1> to vector<4x512xi1>
    %46 = vector.broadcast %cst_13 : f32 to vector<4x512xf32>
    %47 = arith.select %45, %43, %46 : vector<4x512xi1>, vector<4x512xf32>
    %48 = arith.truncf %47 : vector<4x512xf32> to vector<4x512xbf16>
    %c12 = arith.constant 12 : index
    %c0_14 = arith.constant 0 : index
    %49 = vector.load %arg7[%c12, %c0_14] : memref<40x512xbf16, #tpu.memory_space<vmem>>, vector<4x512xbf16>
    tpu.vector_store %arg7[%c12, %c0_14], %48 {strides = array<i32>} : memref<40x512xbf16, #tpu.memory_space<vmem>>, vector<4x512xbf16>,
    %50 = arith.truncf %6 : vector<4x512xf32> to vector<4x512xbf16>
    %c16 = arith.constant 16 : index
    %c0_15 = arith.constant 0 : index
    %51 = vector.load %arg7[%c16, %c0_15] : memref<40x512xbf16, #tpu.memory_space<vmem>>, vector<4x512xbf16>
    tpu.vector_store %arg7[%c16, %c0_15], %50 {strides = array<i32>} : memref<40x512xbf16, #tpu.memory_space<vmem>>, vector<4x512xbf16>,
    %c511_i32 = arith.constant 511 : i32
    %52 = tpu.dynamic_rotate %6 by %c511_i32 dim 1 : vector<4x512xf32>, i32 -> vector<4x512xf32>
    %cst_16 = arith.constant 0.000000e+00 : f32
    %53 = vector.shape_cast %19 : vector<1x512xi1> to vector<1x512xi1>
    %54 = vector.broadcast %53 : vector<1x512xi1> to vector<4x512xi1>
    %55 = vector.broadcast %cst_16 : f32 to vector<4x512xf32>
    %56 = arith.select %54, %52, %55 : vector<4x512xi1>, vector<4x512xf32>
    %57 = arith.truncf %56 : vector<4x512xf32> to vector<4x512xbf16>
    %c20 = arith.constant 20 : index
    %c0_17 = arith.constant 0 : index
    %58 = vector.load %arg7[%c20, %c0_17] : memref<40x512xbf16, #tpu.memory_space<vmem>>, vector<4x512xbf16>
    tpu.vector_store %arg7[%c20, %c0_17], %57 {strides = array<i32>} : memref<40x512xbf16, #tpu.memory_space<vmem>>, vector<4x512xbf16>,
    %c497_i32 = arith.constant 497 : i32
    %59 = tpu.dynamic_rotate %6 by %c497_i32 dim 1 : vector<4x512xf32>, i32 -> vector<4x512xf32>
    %60 = arith.andi %15, %17 : vector<1x512xi1>
    %cst_18 = arith.constant 0.000000e+00 : f32
    %61 = vector.shape_cast %60 : vector<1x512xi1> to vector<1x512xi1>
    %62 = vector.broadcast %61 : vector<1x512xi1> to vector<4x512xi1>
    %63 = vector.broadcast %cst_18 : f32 to vector<4x512xf32>
    %64 = arith.select %62, %59, %63 : vector<4x512xi1>, vector<4x512xf32>
    %65 = arith.truncf %64 : vector<4x512xf32> to vector<4x512xbf16>
    %c24 = arith.constant 24 : index
    %c0_19 = arith.constant 0 : index
    %66 = vector.load %arg7[%c24, %c0_19] : memref<40x512xbf16, #tpu.memory_space<vmem>>, vector<4x512xbf16>
    tpu.vector_store %arg7[%c24, %c0_19], %65 {strides = array<i32>} : memref<40x512xbf16, #tpu.memory_space<vmem>>, vector<4x512xbf16>,
    %c496_i32 = arith.constant 496 : i32
    %67 = tpu.dynamic_rotate %6 by %c496_i32 dim 1 : vector<4x512xf32>, i32 -> vector<4x512xf32>
    %cst_20 = arith.constant 0.000000e+00 : f32
    %68 = vector.shape_cast %15 : vector<1x512xi1> to vector<1x512xi1>
    %69 = vector.broadcast %68 : vector<1x512xi1> to vector<4x512xi1>
    %70 = vector.broadcast %cst_20 : f32 to vector<4x512xf32>
    %71 = arith.select %69, %67, %70 : vector<4x512xi1>, vector<4x512xf32>
    %72 = arith.truncf %71 : vector<4x512xf32> to vector<4x512xbf16>
    %c28 = arith.constant 28 : index
    %c0_21 = arith.constant 0 : index
    %73 = vector.load %arg7[%c28, %c0_21] : memref<40x512xbf16, #tpu.memory_space<vmem>>, vector<4x512xbf16>
    tpu.vector_store %arg7[%c28, %c0_21], %72 {strides = array<i32>} : memref<40x512xbf16, #tpu.memory_space<vmem>>, vector<4x512xbf16>,
    %c495_i32 = arith.constant 495 : i32
    %74 = tpu.dynamic_rotate %6 by %c495_i32 dim 1 : vector<4x512xf32>, i32 -> vector<4x512xf32>
    %75 = arith.andi %15, %19 : vector<1x512xi1>
    %cst_22 = arith.constant 0.000000e+00 : f32
    %76 = vector.shape_cast %75 : vector<1x512xi1> to vector<1x512xi1>
    %77 = vector.broadcast %76 : vector<1x512xi1> to vector<4x512xi1>
    %78 = vector.broadcast %cst_22 : f32 to vector<4x512xf32>
    %79 = arith.select %77, %74, %78 : vector<4x512xi1>, vector<4x512xf32>
    %80 = arith.truncf %79 : vector<4x512xf32> to vector<4x512xbf16>
    %c32 = arith.constant 32 : index
    %c0_23 = arith.constant 0 : index
    %81 = vector.load %arg7[%c32, %c0_23] : memref<40x512xbf16, #tpu.memory_space<vmem>>, vector<4x512xbf16>
    tpu.vector_store %arg7[%c32, %c0_23], %80 {strides = array<i32>} : memref<40x512xbf16, #tpu.memory_space<vmem>>, vector<4x512xbf16>,
    %82 = tpu.iota {dimensions = array<i32: 0>} : vector<4x512xi32>
    %c0_i32 = arith.constant 0 : i32
    %83 = vector.broadcast %c0_i32 : i32 to vector<4x512xi32>
    %84 = arith.cmpi eq, %82, %83 : vector<4x512xi32>
    %cst_24 = arith.constant 1.000000e+00 : f32
    %cst_25 = arith.constant 0.000000e+00 : f32
    %85 = vector.broadcast %cst_24 : f32 to vector<4x512xf32>
    %86 = vector.broadcast %cst_25 : f32 to vector<4x512xf32>
    %87 = arith.select %84, %85, %86 : vector<4x512xi1>, vector<4x512xf32>
    %88 = arith.truncf %87 : vector<4x512xf32> to vector<4x512xbf16>
    %c36 = arith.constant 36 : index
    %c0_26 = arith.constant 0 : index
    %89 = vector.load %arg7[%c36, %c0_26] : memref<40x512xbf16, #tpu.memory_space<vmem>>, vector<4x512xbf16>
    tpu.vector_store %arg7[%c36, %c0_26], %88 {strides = array<i32>} : memref<40x512xbf16, #tpu.memory_space<vmem>>, vector<4x512xbf16>,
    %c0_27 = arith.constant 0 : index
    %c0_28 = arith.constant 0 : index
    %90 = vector.load %arg2[%c0_27, %c0_28] : memref<16x40xbf16, #tpu.memory_space<vmem>>, vector<16x40xbf16>
    %c0_29 = arith.constant 0 : index
    %c0_30 = arith.constant 0 : index
    %91 = vector.load %arg7[%c0_29, %c0_30] : memref<40x512xbf16, #tpu.memory_space<vmem>>, vector<40x512xbf16>
    %cst_31 = arith.constant dense<0.000000e+00> : vector<16x512xf32>
    %92 = tpu.matmul %90, %91, %cst_31 {dimension_numbers = #tpu.dot_dimension_numbers<[1], [0], [0], [1], [0, 0, 1, 1], [], []>} : vector<16x40xbf16>, vector<40x512xbf16>, vector<16x512xf32> -> vector<16x512xf32>
    %cst_32 = arith.constant 0.000000e+00 : f32
    %93 = vector.broadcast %cst_32 : f32 to vector<16x512xf32>
    %94 = arith.maximumf %92, %93 : vector<16x512xf32>
    %c0_33 = arith.constant 0 : index
    %c0_34 = arith.constant 0 : index
    %95 = vector.load %arg3[%c0_33, %c0_34] : memref<5x16xbf16, #tpu.memory_space<vmem>>, vector<5x16xbf16>
    %96 = arith.truncf %94 : vector<16x512xf32> to vector<16x512xbf16>
    %cst_35 = arith.constant dense<0.000000e+00> : vector<5x512xf32>
    %97 = tpu.matmul %95, %96, %cst_35 {dimension_numbers = #tpu.dot_dimension_numbers<[1], [0], [0], [1], [0, 0, 1, 1], [], []>} : vector<5x16xbf16>, vector<16x512xbf16>, vector<5x512xf32> -> vector<5x512xf32>
    %98 = vector.extract_strided_slice %97 {offsets = [0, 0], sizes = [5, 256], strides = [1, 1]} : vector<5x512xf32> to vector<5x256xf32>
    %99 = vector.extract_strided_slice %98 {offsets = [0, 0], sizes = [1, 256], strides = [1, 1]} : vector<5x256xf32> to vector<1x256xf32>
    %c0_36 = arith.constant 0 : index
    %c0_37 = arith.constant 0 : index
    %c0_38 = arith.constant 0 : index
    %100 = vector.load %arg4[%c0_36, %c0_37, %c0_38] : memref<2x1x256xf32, #tpu.memory_space<vmem>>, vector<1x1x256xf32>
    %101 = vector.shape_cast %100 : vector<1x1x256xf32> to vector<1x256xf32>
    %102 = vector.shape_cast %99 : vector<1x256xf32> to vector<1x1x256xf32>
    tpu.vector_store %arg4[%c0_36, %c0_37, %c0_38], %102 {strides = array<i32>} : memref<2x1x256xf32, #tpu.memory_space<vmem>>, vector<1x1x256xf32>,
    %103 = vector.extract_strided_slice %98 {offsets = [1, 0], sizes = [2, 256], strides = [1, 1]} : vector<5x256xf32> to vector<2x256xf32>
    %c0_39 = arith.constant 0 : index
    %c0_40 = arith.constant 0 : index
    %c0_41 = arith.constant 0 : index
    %104 = vector.load %arg5[%c0_39, %c0_40, %c0_41] : memref<2x2x256xf32, #tpu.memory_space<vmem>>, vector<1x2x256xf32>
    %105 = vector.shape_cast %104 : vector<1x2x256xf32> to vector<2x256xf32>
    %106 = vector.shape_cast %103 : vector<2x256xf32> to vector<1x2x256xf32>
    tpu.vector_store %arg5[%c0_39, %c0_40, %c0_41], %106 {strides = array<i32>} : memref<2x2x256xf32, #tpu.memory_space<vmem>>, vector<1x2x256xf32>,
    %107 = vector.extract_strided_slice %98 {offsets = [3, 0], sizes = [2, 256], strides = [1, 1]} : vector<5x256xf32> to vector<2x256xf32>
    %c0_42 = arith.constant 0 : index
    %c0_43 = arith.constant 0 : index
    %c0_44 = arith.constant 0 : index
    %108 = vector.load %arg6[%c0_42, %c0_43, %c0_44] : memref<2x2x256xf32, #tpu.memory_space<vmem>>, vector<1x2x256xf32>
    %109 = vector.shape_cast %108 : vector<1x2x256xf32> to vector<2x256xf32>
    %110 = vector.shape_cast %107 : vector<2x256xf32> to vector<1x2x256xf32>
    tpu.vector_store %arg6[%c0_42, %c0_43, %c0_44], %110 {strides = array<i32>} : memref<2x2x256xf32, #tpu.memory_space<vmem>>, vector<1x2x256xf32>,
    %111 = vector.extract_strided_slice %97 {offsets = [0, 256], sizes = [5, 256], strides = [1, 1]} : vector<5x512xf32> to vector<5x256xf32>
    %112 = vector.extract_strided_slice %111 {offsets = [0, 0], sizes = [1, 256], strides = [1, 1]} : vector<5x256xf32> to vector<1x256xf32>
    %c1_45 = arith.constant 1 : index
    %c0_46 = arith.constant 0 : index
    %c0_47 = arith.constant 0 : index
    %113 = vector.load %arg4[%c1_45, %c0_46, %c0_47] : memref<2x1x256xf32, #tpu.memory_space<vmem>>, vector<1x1x256xf32>
    %114 = vector.shape_cast %113 : vector<1x1x256xf32> to vector<1x256xf32>
    %115 = vector.shape_cast %112 : vector<1x256xf32> to vector<1x1x256xf32>
    tpu.vector_store %arg4[%c1_45, %c0_46, %c0_47], %115 {strides = array<i32>} : memref<2x1x256xf32, #tpu.memory_space<vmem>>, vector<1x1x256xf32>,
    %116 = vector.extract_strided_slice %111 {offsets = [1, 0], sizes = [2, 256], strides = [1, 1]} : vector<5x256xf32> to vector<2x256xf32>
    %c1_48 = arith.constant 1 : index
    %c0_49 = arith.constant 0 : index
    %c0_50 = arith.constant 0 : index
    %117 = vector.load %arg5[%c1_48, %c0_49, %c0_50] : memref<2x2x256xf32, #tpu.memory_space<vmem>>, vector<1x2x256xf32>
    %118 = vector.shape_cast %117 : vector<1x2x256xf32> to vector<2x256xf32>
    %119 = vector.shape_cast %116 : vector<2x256xf32> to vector<1x2x256xf32>
    tpu.vector_store %arg5[%c1_48, %c0_49, %c0_50], %119 {strides = array<i32>} : memref<2x2x256xf32, #tpu.memory_space<vmem>>, vector<1x2x256xf32>,
    %120 = vector.extract_strided_slice %111 {offsets = [3, 0], sizes = [2, 256], strides = [1, 1]} : vector<5x256xf32> to vector<2x256xf32>
    %c1_51 = arith.constant 1 : index
    %c0_52 = arith.constant 0 : index
    %c0_53 = arith.constant 0 : index
    %121 = vector.load %arg6[%c1_51, %c0_52, %c0_53] : memref<2x2x256xf32, #tpu.memory_space<vmem>>, vector<1x2x256xf32>
    %122 = vector.shape_cast %121 : vector<1x2x256xf32> to vector<2x256xf32>
    %123 = vector.shape_cast %120 : vector<2x256xf32> to vector<1x2x256xf32>
    tpu.vector_store %arg6[%c1_51, %c0_52, %c0_53], %123 {strides = array<i32>} : memref<2x2x256xf32, #tpu.memory_space<vmem>>, vector<1x2x256xf32>,
    return
  }
  func.func @transform_0(%arg0: i32) -> (i32, i32, i32) {
    %c0_i32 = arith.constant 0 : i32
    %c0_i32_0 = arith.constant 0 : i32
    %c0_i32_1 = arith.constant 0 : i32
    return %arg0, %c0_i32, %c0_i32_0 : i32, i32, i32
  }
  func.func @transform_1(%arg0: i32) -> (i32, i32) {
    %c0_i32 = arith.constant 0 : i32
    %c0_i32_0 = arith.constant 0 : i32
    %c0_i32_1 = arith.constant 0 : i32
    return %c0_i32, %c0_i32_0 : i32, i32
  }
  func.func @transform_2(%arg0: i32) -> (i32, i32) {
    %c0_i32 = arith.constant 0 : i32
    %c0_i32_0 = arith.constant 0 : i32
    %c0_i32_1 = arith.constant 0 : i32
    return %c0_i32, %c0_i32_0 : i32, i32
  }
  func.func @transform_3(%arg0: i32) -> (i32, i32, i32) {
    %c0_i32 = arith.constant 0 : i32
    %c0_i32_0 = arith.constant 0 : i32
    %c0_i32_1 = arith.constant 0 : i32
    return %arg0, %c0_i32, %c0_i32_0 : i32, i32, i32
  }
  func.func @transform_4(%arg0: i32) -> (i32, i32, i32) {
    %c0_i32 = arith.constant 0 : i32
    %c0_i32_0 = arith.constant 0 : i32
    %c0_i32_1 = arith.constant 0 : i32
    return %arg0, %c0_i32, %c0_i32_0 : i32, i32, i32
  }
  func.func @transform_5(%arg0: i32) -> (i32, i32, i32) {
    %c0_i32 = arith.constant 0 : i32
    %c0_i32_0 = arith.constant 0 : i32
    %c0_i32_1 = arith.constant 0 : i32
    return %arg0, %c0_i32, %c0_i32_0 : i32, i32, i32
  }
}

</mosaic_0001>

<bundles_post_ra>
// kernel: detect_head_forward.1
= control target key start
LH: loop header
LB: loop body
LE: loop exit
PB: predicated region body
PF: predicated region fallthrough
CT: control target
= control target key end

     0   :  { %v29_v6 = vlaneseq  ;;  %v1018_v8 = vmov 839922192   ;;  %s1019_s22 = smov 127   ;;  %s1020_s23 = smov 111   ;;  %v1021_v13 = vmov 0.0   ;;  %v1028_v23 = vmov 0   ;;  %s1364_s0 = inlined_call_operand.vmem [shape: bf16[2,4,256], index: 0, kind: input, shape index: {}]   ;;  %s1365_s1 = inlined_call_operand.vmem [shape: bf16[16,40], index: 1, kind: input, shape index: {}]   ;;  %s1366_s2 = inlined_call_operand.vmem [shape: bf16[5,16], index: 2, kind: input, shape index: {}]   ;;  %s1367_s3 = inlined_call_operand.vmem [shape: f32[2,1,256], index: 3, kind: output, shape index: {0}]   ;;  %s1368_s4 = inlined_call_operand.vmem [shape: f32[2,2,256], index: 4, kind: output, shape index: {1}]   ;;  %s1369_s5 = inlined_call_operand.vmem [shape: f32[2,2,256], index: 5, kind: output, shape index: {2}]  }
   0x1   :  { %v18_v0 = vld [vmem:[%s1364_s0] sm:$0xf]  ;;  %v848_v1 = vld [vmem:[%s1364_s0 + $0x4] sm:$0xf]  ;;  %v451_v9 = vunpack.c.l.s4 %v1018_v8  ;;  %s1022_s0 = smov 112   ;;  %s1023_s24 = smov 113   ;;  %577 = vmatprep.mubr.bf16.mxu0 %v1028_v23  ;;  %620 = vmatprep.mubr.bf16.mxu1 %v1028_v23 }
   0x2   :  { %v19_v2 = vunpack.c.l.bf16 %v18_v0  ;;  %v22_v3 = vunpack.c.l.bf16 %v848_v1  ;;  %v1068_v10 = vshrl.u32 %v29_v6, 7  ;;  %s1024_s25 = smov 16   ;;  %s1025_s26 = smov 1   ;;  %v1075_v24 = vand.u32 127, %v29_v6 }
   0x3   :  { %v452_v12 = vunpack.c.0.s8 %v451_v9  ;;  %s1026_s27 = smov 17   ;;  %s1027_s28 = smov 15  }
   0x4   :  { %v24_v4 = vcombine.high %v19_v2, %v19_v2  ;;  %v27_v5 = vcombine.high %v22_v3, %v22_v3  ;;  %vm446_vm0 = vcmp.eq.s32.totalorder %v1068_v10, 0  ;;  %v31_v25 = vadd.s32 128, %v1075_v24 }
   0x5   :  { %v447_v14 = vsel %vm446_vm0, 1.0, %v1021_v13  ;;  %v455_v15 = vsub.s32 %v452_v12, %v1068_v10  ;;  %v1079_v26 = vadd.s32 256, %v1075_v24  ;;  %v33_v27 = vadd.s32 384, %v1075_v24 }
   0x6   :  { %v934_v7 = vpack.i.bf16 %v24_v4, %v19_v2  ;;  %v939_v11 = vpack.i.bf16 %v27_v5, %v22_v3  ;;  %v448_v16 = vpack.c.bf16 %v447_v14, %v447_v14  ;;  %v243_v17 = vpack.c.bf16 %v24_v4, %v24_v4 }
   0x7   :  { %v245_v18 = vpack.c.bf16 %v27_v5, %v27_v5  ;;  %v34_v28 = vand.u32 255, %v1075_v24  ;;  %v35_v29 = vand.u32 255, %v31_v25  ;;  %v36_v30 = vand.u32 255, %v1079_v26 }
   0x8   :  { %935 = vrot.lane.b32.xlu1 %v934_v7, %s1019_s22  ;;  %925 = vrot.lane.b32.xlu0 %v934_v7, %s1020_s23  ;;  %v456_v19 = vrot.slane %v448_v16, %v455_v15  ;;  %v901_v20 = vcombine.low %v18_v0, %v243_v17  ;;  %v37_v31 = vand.u32 255, %v33_v27  ;;  %vm268_vm1 = vcmp.lt.s32.totalorder %v1075_v24, 127 }
   0x9   :  { %v902_v21 = vcombine.low %v848_v1, %v245_v18  ;;  %v1086_v32 = vand.u32 15, %v34_v28  ;;  %v1088_v33 = vand.u32 15, %v35_v29  ;;  %vm405_vm2 = vcmp.lt.s32.totalorder %v1075_v24, 111 }
   0xa   :  { %v457_v22 = vrot.slane %v456_v19, 6  ;;  %258 = vst [vmem:[#allocation2 + $0x48] sm:$0x33] %v901_v20  ;;  %v1092_v36 = vand.u32 15, %v36_v30  ;;  %v1094_v37 = vand.u32 15, %v37_v31  ;;  %vm360_vm4 = vcmp.lt.s32.totalorder %v1075_v24, 112 }
   0xb   :  { %259 = vst [vmem:[#allocation2 + $0x28] sm:$0x33] %v902_v21  ;;  %vm1371_vm3 = vcmp.le.s32.totalorder %v1086_v32, 14  ;;  %vm1370_vm5 = vcmp.le.s32.totalorder %v1088_v33, 14  ;;  %vm1103_vm6 = vcmp.lt.s32.totalorder %v35_v29, 240  ;;  %vm1109_vm9 = vcmp.lt.s32.totalorder %v37_v31, 240 }
   0xc   :  { %940 = vrot.lane.b32.xlu1 %v939_v11, %s1019_s22  ;;  %930 = vrot.lane.b32.xlu0 %v939_v11, %s1020_s23  ;;  %459 = vst [vmem:[#allocation2 + $0x40] sm:$0xcc] %v457_v22  ;;  %460 = vst [vmem:[#allocation2 + $0x38] sm:$0xcc] %v457_v22  ;;  %vm56_vm7 = vcmp.le.s32.totalorder %v1092_v36, 14  ;;  %vm1372_vm8 = vcmp.le.s32.totalorder %v1094_v37, 14 }
   0xd   :  { %vm313_vm10 = vcmp.lt.s32.totalorder %v1075_v24, 113  ;;  %vm52_vm11 = vcmp.ge.s32.totalorder %v1092_v36, 1  ;;  %vm1123_vm12 = vmand %vm1103_vm6, %vm1370_vm5  ;;  %vm51_vm13 = vcmp.ge.s32.totalorder %v1088_v33, 1  ;;  %vm53_vm14 = vcmp.ge.s32.totalorder %v1094_v37, 1 }
   0xe   :  { %vm1139_vm15 = vmand %vm1109_vm9, %vm1372_vm8  ;;  %vm50_vm0 = vcmp.ge.s32.totalorder %v1086_v32, 1 }
  0x10   :  { %950 = vrot.lane.b32.xlu1 %v939_v11, %s1022_s0  ;;  %945 = vrot.lane.b32.xlu0 %v934_v7, %s1022_s0 }
  0x14   :  { %960 = vrot.lane.b32.xlu1 %v939_v11, %s1023_s24  ;;  %955 = vrot.lane.b32.xlu0 %v934_v7, %s1023_s24 }
  0x18   :  { %970 = vrot.lane.b32.xlu1 %v939_v11, %s1024_s25  ;;  %965 = vrot.lane.b32.xlu0 %v934_v7, %s1024_s25 }
  0x1c   :  { %980 = vrot.lane.b32.xlu1 %v939_v11, %s1025_s26  ;;  %975 = vrot.lane.b32.xlu0 %v934_v7, %s1025_s26 }
  0x20   :  { %990 = vrot.lane.b32.xlu1 %v939_v11, %s1026_s27  ;;  %985 = vrot.lane.b32.xlu0 %v934_v7, %s1026_s27 }
  0x24   :  { %1000 = vrot.lane.b32.xlu1 %v939_v11, %s1027_s28  ;;  %995 = vrot.lane.b32.xlu0 %v934_v7, %s1027_s28 }
  0x7a   :  { %v936_v34 = vpop.permute.xlu1 %935  ;;  %v926_v35 = vpop.permute.xlu0 %925 }
  0x7b   :  { %v938_v38 = vunpack.i.h.bf16 %v936_v34  ;;  %v937_v39 = vunpack.i.l.bf16 %v936_v34  ;;  %v928_v40 = vunpack.i.h.bf16 %v926_v35  ;;  %v927_v41 = vunpack.i.l.bf16 %v926_v35 }
  0x7d   :  { %v271_v42 = vsel %vm268_vm1, %v937_v39, %v938_v38  ;;  %v408_v43 = vsel %vm405_vm2, %v927_v41, %v928_v40 }
  0x7e   :  { %v941_v45 = vpop.permute.xlu1 %940  ;;  %v931_v47 = vpop.permute.xlu0 %930  ;;  %v281_v52 = vsel %vm1371_vm3, %v271_v42, 0.0  ;;  %v422_v53 = vsel %vm1371_vm3, %v408_v43, 0.0  ;;  %vm1180_vm3 = vmand %vm1103_vm6, %vm51_vm13 }
  0x7f   :  { %v943_v48 = vunpack.i.h.bf16 %v941_v45  ;;  %v942_v49 = vunpack.i.l.bf16 %v941_v45  ;;  %v933_v50 = vunpack.i.h.bf16 %v931_v47  ;;  %v932_v51 = vunpack.i.l.bf16 %v931_v47 }
  0x81   :  { %v269_v55 = vsel %vm268_vm1, %v942_v49, %v943_v48  ;;  %v270_v56 = vsel %vm268_vm1, %v938_v38, %v942_v49  ;;  %v272_v57 = vsel %vm268_vm1, %v943_v48, %v937_v39  ;;  %v406_v59 = vsel %vm405_vm2, %v932_v51, %v933_v50 }
  0x82   :  { %v282_v60 = vsel %vm1370_vm5, %v270_v56, 0.0  ;;  %v283_v61 = vsel %vm56_vm7, %v269_v55, 0.0  ;;  %v284_v62 = vsel %vm1372_vm8, %v272_v57, 0.0  ;;  %v407_v63 = vsel %vm405_vm2, %v928_v40, %v932_v51  ;;  %v951_v0 = vpop.permute.xlu1 %950  ;;  %v946_v1 = vpop.permute.xlu0 %945  ;;  %vm1200_vm8 = vmand %vm1109_vm9, %vm53_vm14 }
  0x83   :  { %v903_v2 = vpack.c.bf16 %v282_v60, %v281_v52  ;;  %v904_v3 = vpack.c.bf16 %v284_v62, %v283_v61  ;;  %v409_v4 = vsel %vm405_vm2, %v933_v50, %v927_v41  ;;  %v423_v5 = vsel %vm1123_vm12, %v407_v63, 0.0 }
  0x84   :  { %vm113_vm1 = vcmp.lt.s32.totalorder %v1075_v24, 16  ;;  %v424_v7 = vsel %vm56_vm7, %v406_v59, 0.0  ;;  %v425_v8 = vsel %vm1139_vm15, %v409_v4, 0.0  ;;  %v909_v9 = vpack.c.bf16 %v423_v5, %v422_v53 }
  0x85   :  { %v953_v11 = vunpack.i.h.bf16 %v951_v0  ;;  %v299_v12 = vrot.slane %v903_v2, 6  ;;  %v300_v13 = vrot.slane %v904_v3, 6  ;;  %v910_v14 = vpack.c.bf16 %v425_v8, %v424_v7 }
  0x86   :  { %v952_v15 = vunpack.i.l.bf16 %v951_v0  ;;  %vm1163_vm5 = vcmp.ge.s32.totalorder %v36_v30, 16  ;;  %442 = vst [vmem:[#allocation2 + $0x40] sm:$0x33] %v909_v9  ;;  %v948_v17 = vunpack.i.h.bf16 %v946_v1  ;;  %v947_v18 = vunpack.i.l.bf16 %v946_v1  ;;  %v961_v19 = vpop.permute.xlu1 %960  ;;  %v956_v20 = vpop.permute.xlu0 %955 }
  0x87   :  { %vm1169_vm2 = vcmp.ge.s32.totalorder %v34_v28, 16  ;;  %vm205_vm12 = vcmp.lt.s32.totalorder %v1075_v24, 1  ;;  %vm532_vm15 = vcmask 1043456   ;;  %303 = vst [vmem:[#allocation2 + $0x48] sm:$0xcc] %v299_v12  ;;  %v963_v25 = vunpack.i.h.bf16 %v961_v19 }
  0x88   :  { %304 = vst [vmem:[#allocation2 + $0x28] sm:$0xcc] %v300_v13  ;;  %443 = vst [vmem:[#allocation2 + $0x38] sm:$0x33] %v910_v14  ;;  %v361_v22 = vsel %vm360_vm4, %v952_v15, %v953_v11  ;;  %v962_v26 = vunpack.i.l.bf16 %v961_v19  ;;  %v958_v28 = vunpack.i.h.bf16 %v956_v20  ;;  %v362_v29 = vsel %vm360_vm4, %v948_v17, %v952_v15 }
  0x89   :  { %v363_v30 = vsel %vm360_vm4, %v947_v18, %v948_v17  ;;  %v364_v31 = vsel %vm360_vm4, %v953_v11, %v947_v18  ;;  %v957_v34 = vunpack.i.l.bf16 %v956_v20  ;;  %v374_v35 = vsel %vm1103_vm6, %v362_v29, 0.0  ;;  %vm1253_vm4 = vmand %vm1169_vm2, %vm50_vm0 }
  0x8a   :  { %v376_v38 = vsel %vm1109_vm9, %v364_v31, 0.0  ;;  %v314_v39 = vsel %vm313_vm10, %v962_v26, %v963_v25  ;;  %v315_v41 = vsel %vm313_vm10, %v958_v28, %v962_v26  ;;  %v907_v42 = vpack.c.bf16 %v374_v35, %v363_v30  ;;  %v971_v47 = vpop.permute.xlu1 %970  ;;  %v966_v48 = vpop.permute.xlu0 %965  ;;  %vm1262_vm6 = vmand %vm1163_vm5, %vm52_vm11 }
  0x8b   :  { %v908_v43 = vpack.c.bf16 %v376_v38, %v361_v22  ;;  %v332_v44 = vsel %vm52_vm11, %v314_v39, 0.0  ;;  %v331_v45 = vsel %vm1180_vm3, %v315_v41, 0.0  ;;  %v316_v46 = vsel %vm313_vm10, %v957_v34, %v958_v28  ;;  %vm1290_vm9 = vmand %vm1163_vm5, %vm56_vm7 }
  0x8c   :  { %v317_v49 = vsel %vm313_vm10, %v963_v25, %v957_v34  ;;  %v973_v50 = vunpack.i.h.bf16 %v971_v47  ;;  %v972_v51 = vunpack.i.l.bf16 %v971_v47  ;;  %v391_v52 = vrot.slane %v907_v42, 6 }
  0x8d   :  { %v392_v53 = vrot.slane %v908_v43, 6  ;;  %v330_v54 = vsel %vm50_vm0, %v316_v46, 0.0  ;;  %v333_v55 = vsel %vm1200_vm8, %v317_v49, 0.0  ;;  %v968_v58 = vunpack.i.h.bf16 %v966_v48  ;;  %v471_v59 = vld [vmem:[#allocation2 + $0x40] sm:$0xff] }
  0x8e   :  { %v905_v56 = vpack.c.bf16 %v331_v45, %v330_v54  ;;  %v906_v57 = vpack.c.bf16 %v333_v55, %v332_v44  ;;  %vm66_vm3 = vcmp.lt.s32.totalorder %v1075_v24, 17  ;;  %395 = vst [vmem:[#allocation2 + $0x8] sm:$0xcc] %v391_v52  ;;  %v114_v60 = vsel %vm113_vm1, %v972_v51, %v973_v50  ;;  %v981_v62 = vpop.permute.xlu1 %980  ;;  %v976_v63 = vpop.permute.xlu0 %975 }
  0x8f   :  { %396 = vst [vmem:[#allocation2 + $0x20] sm:$0xcc] %v392_v53  ;;  %v967_v61 = vunpack.i.l.bf16 %v966_v48  ;;  %v879_v0 = vcombine.high %v471_v59, %v471_v59  ;;  %v878_v1 = vcombine.low %v471_v59, %v471_v59  ;;  %v115_v2 = vsel %vm113_vm1, %v968_v58, %v972_v51  ;;  %v472_v17 = vld [vmem:[#allocation2 + $0x38] sm:$0xff] }
  0x90   :  { %350 = vst [vmem:[#allocation2 + $0x8] sm:$0x33] %v905_v56  ;;  %351 = vst [vmem:[#allocation2 + $0x20] sm:$0x33] %v906_v57  ;;  %v983_v3 = vunpack.i.h.bf16 %v981_v62  ;;  %v982_v4 = vunpack.i.l.bf16 %v981_v62  ;;  %v978_v5 = vunpack.i.h.bf16 %v976_v63  ;;  %v128_v7 = vsel %vm1163_vm5, %v115_v2, 0.0 }
  0x91   :  { %v116_v8 = vsel %vm113_vm1, %v967_v61, %v968_v58  ;;  %v117_v9 = vsel %vm113_vm1, %v973_v50, %v967_v61  ;;  %v977_v11 = vunpack.i.l.bf16 %v976_v63  ;;  %882 = vmatprep.subr.msk.bf16.mxu0 %vm532_vm15, %v879_v0  ;;  %v896_v12 = vpack.c.bf16 %v114_v60, %v128_v7  ;;  %v467_v7 = vld [vmem:[#allocation2 + $0x48] sm:$0xff] }
  0x92   :  { %v126_v13 = vsel %vm1169_vm2, %v117_v9, 0.0  ;;  %v206_v14 = vsel %vm205_vm12, %v982_v4, %v983_v3  ;;  %v207_v15 = vsel %vm205_vm12, %v978_v5, %v982_v4  ;;  %v991_v25 = vpop.permute.xlu1 %990  ;;  %v986_v26 = vpop.permute.xlu0 %985  ;;  %v881_v35 = vcombine.high %v472_v17, %v472_v17 }
  0x93   :  { %v895_v18 = vpack.c.bf16 %v116_v8, %v126_v13  ;;  %v221_v19 = vsel %vm53_vm14, %v206_v14, 0.0  ;;  %v220_v20 = vsel %vm52_vm11, %v207_v15, 0.0  ;;  %v208_v22 = vsel %vm205_vm12, %v977_v11, %v978_v5 }
  0x94   :  { %v145_v27 = vrot.slane %v896_v12, 6  ;;  %v900_v28 = vpack.c.bf16 %v221_v19, %v220_v20  ;;  %v209_v29 = vsel %vm205_vm12, %v983_v3, %v977_v11  ;;  %v219_v30 = vsel %vm51_vm13, %v208_v22, 0.0  ;;  %884 = vmatprep.subr.msk.bf16.mxu1 %vm532_vm15, %v881_v35 }
  0x95   :  { %v144_v31 = vrot.slane %v895_v18, 6  ;;  %v218_v34 = vsel %vm50_vm0, %v209_v29, 0.0  ;;  %v534_v38 = vsel %vm532_vm15, %v878_v1, 0  ;;  %v880_v41 = vcombine.low %v472_v17, %v472_v17 }
  0x96   :  { %149 = vst [vmem:[#allocation2] sm:$0xcc] %v145_v27  ;;  %v237_v39 = vrot.slane %v900_v28, 6  ;;  %v899_v40 = vpack.c.bf16 %v219_v30, %v218_v34  ;;  %556 = vmatpush1.bf16.msra.mxu0 %v534_v38  ;;  %v993_v42 = vunpack.i.h.bf16 %v991_v25  ;;  %v992_v44 = vunpack.i.l.bf16 %v991_v25  ;;  %v1001_v46 = vpop.permute.xlu1 %1000  ;;  %v996_v54 = vpop.permute.xlu0 %995 }
  0x97   :  { %148 = vst [vmem:[#allocation2 + $0x30] sm:$0xcc] %v144_v31  ;;  %v988_v47 = vunpack.i.h.bf16 %v986_v26  ;;  %v987_v48 = vunpack.i.l.bf16 %v986_v26  ;;  %vm158_vm8 = vcmp.lt.s32.totalorder %v1075_v24, 15  ;;  %v1008_v49 = vld [vmem:[#allocation2 + $0x2c] ss:$-8 sps:$4 sm:$0xff]   ;;  %v540_v51 = vsel %vm532_vm15, %v880_v41, 0 }
  0x98   :  { %241 = vst [vmem:[#allocation2 + $0x10] sm:$0xcc] %v237_v39  ;;  %v236_v50 = vrot.slane %v899_v40, 6  ;;  %v1003_v52 = vunpack.i.h.bf16 %v1001_v46  ;;  %v1002_v53 = vunpack.i.l.bf16 %v1001_v46  ;;  %599 = vmatpush1.bf16.msra.mxu1 %v540_v51  ;;  %v67_v55 = vsel %vm66_vm3, %v992_v44, %v993_v42  ;;  %v469_v59 = vld [vmem:[#allocation2 + $0x8] sm:$0xff]  ;;  %v1017_v24 = vld [vmem:[%s1365_s1] sm:$0xff]  }
  0x99   :  { %v68_v56 = vsel %vm66_vm3, %v988_v47, %v992_v44  ;;  %v69_v57 = vsel %vm66_vm3, %v987_v48, %v988_v47  ;;  %v70_v58 = vsel %vm66_vm3, %v993_v42, %v987_v48  ;;  %v1010_v60 = vld [vmem:[#allocation2 + $0x28] ss:$-8 sps:$4 sm:$0xff]   ;;  %v86_v61 = vsel %vm53_vm14, %v67_v55, 0.0  ;;  %600 = vmatprep.subr.bf16.mxu1 %v1008_v49 }
  0x9a   :  { %240 = vst [vmem:[#allocation2 + $0x18] sm:$0xcc] %v236_v50  ;;  %v85_v62 = vsel %vm1262_vm6, %v68_v56, 0.0  ;;  %v83_v63 = vsel %vm1253_vm4, %v70_v58, 0.0  ;;  %v84_v0 = vsel %vm51_vm13, %v69_v57, 0.0  ;;  %v159_v3 = vsel %vm158_vm8, %v1002_v53, %v1003_v52 }
  0x9b   :  { %v894_v1 = vpack.c.bf16 %v86_v61, %v85_v62  ;;  %v893_v2 = vpack.c.bf16 %v84_v0, %v83_v63  ;;  %v998_v5 = vunpack.i.h.bf16 %v996_v54  ;;  %vm1395_vm10 = vcmp.le.s32.totalorder %v1094_v37, 14  ;;  %v639_v48 = vld [vmem:[%s1366_s2] sm:$0x7] }
  0x9c   :  { %v178_v8 = vsel %vm1395_vm10, %v159_v3, 0.0  ;;  %vm1396_vm11 = vcmp.le.s32.totalorder %v1086_v32, 14  ;;  %v997_v36 = vunpack.i.l.bf16 %v996_v54  ;;  %v875_v11 = vcombine.high %v467_v7, %v469_v59  ;;  %601 = vmatpush1.bf16.msra.mxu1 %v1010_v60 }
  0x9d   :  { %vm1300_vm13 = vmand %vm1169_vm2, %vm1396_vm11  ;;  %v874_v16 = vcombine.low %v467_v7, %v469_v59  ;;  %104 = vst [vmem:[#allocation2] sm:$0x33] %v894_v1  ;;  %v160_v12 = vsel %vm158_vm8, %v998_v5, %v1002_v53  ;;  %vm1399_vm5 = vcmp.le.s32.totalorder %v1088_v33, 14  ;;  %vm528_vm7 = vcmask 326656  }
  0x9e   :  { %103 = vst [vmem:[#allocation2 + $0x30] sm:$0x33] %v893_v2  ;;  %v177_v37 = vsel %vm1290_vm9, %v160_v12, 0.0  ;;  %v161_v32 = vsel %vm158_vm8, %v997_v36, %v998_v5  ;;  %v162_v21 = vsel %vm158_vm8, %v1003_v52, %v997_v36  ;;  %557 = vmatprep.subr.bf16.mxu0 %v875_v11  ;;  %vm644_vm14 = vcmask 130048  }
  0x9f   :  { %v898_v13 = vpack.c.bf16 %v178_v8, %v177_v37  ;;  %v175_v14 = vsel %vm1300_vm13, %v162_v21, 0.0  ;;  %v176_v15 = vsel %vm1399_vm5, %v161_v32, 0.0  ;;  %558 = vmatpush1.bf16.msra.mxu0 %v874_v16  ;;  %v1029_v46 = vmov 1966171168  }
  0xa0   :  { %v897_v17 = vpack.c.bf16 %v176_v15, %v175_v14  ;;  %v734_v49 = vunpack.c.l.s4 %v1029_v46  ;;  %v1030_v50 = vmov 1983009808   ;;  %vm761_vm0 = vcmask 1040384  }
  0xa1   :  { %196 = vst [vmem:[#allocation2 + $0x10] sm:$0x33] %v898_v13  ;;  %v754_v51 = vunpack.c.l.s4 %v1030_v50  ;;  %vm762_vm1 = vcmask 1042434   ;;  %vm764_vm12 = vcmask 1044484   ;;  %vm766_vm3 = vcmask 1046534  }
  0xa2   :  { %195 = vst [vmem:[#allocation2 + $0x18] sm:$0x33] %v897_v17  ;;  %v735_v52 = vunpack.c.0.s8 %v734_v49  ;;  %vm763_vm2 = vmor %vm761_vm0, %vm762_vm1  ;;  %vm750_vm4 = vcmp.lt.s32.totalorder %v29_v6, 256 }
  0xa3   :  { %v755_v53 = vunpack.c.0.s8 %v754_v51  ;;  %vm1326_vm15 = vmor %vm763_vm2, %vm764_vm12 }
  0xa4   :  { %v738_v56 = vsub.s32 %v735_v52, %v1068_v10  ;;  %vm1334_vm6 = vmor %vm1326_vm15, %vm766_vm3 }
  0xa5   :  { %v758_v57 = vsub.s32 %v755_v53, %v1068_v10 }
  0xa8   :  { %v1013_v18 = vld [vmem:[#allocation2 + $0x4] ss:$16 sps:$4 sm:$0xff]   ;;  %v1016_v19 = vld [vmem:[#allocation2] ss:$16 sps:$4 sm:$0xff]  }
  0xa9   :  { %v1011_v20 = vld [vmem:[#allocation2 + $0x34] ss:$-24 sps:$4 sm:$0xff]   ;;  %v1015_v22 = vld [vmem:[#allocation2 + $0x30] ss:$-24 sps:$4 sm:$0xff]   ;;  %602 = vmatprep.subr.bf16.mxu1 %v1013_v18 }
  0xaa   :  { %559 = vmatprep.subr.bf16.mxu0 %v1011_v20  ;;  %603 = vmatpush1.bf16.msra.mxu1 %v1016_v19 }
  0xab   :  { %560 = vmatpush1.bf16.msra.mxu0 %v1015_v22 }
  0xad   :  { %885 = vmatmul.mubr.msk.bf16.vlgmr.msra.gmra.mxu1 %vm528_vm7, %v1017_v24 }
  0xae   :  { %883 = vmatmul.mubr.msk.bf16.vlgmr.msra.gmra.mxu0 %vm528_vm7, %v1017_v24  ;;  %721 = vmatprep.mubr.bf16.mxu1 %v1028_v23 }
  0xaf   :  { %680 = vmatprep.mubr.bf16.mxu0 %v1028_v23 }
 0x16d   :  { %v622_v33 = vpop.f32.mrf.mxu1 }
 0x16e   :  { %v579_v25 = vpop.f32.mrf.mxu0  ;;  %v633_v40 = vmax.f32 %v622_v33, 0.0 }
 0x16f   :  { %v624_v26 = vpop.f32.mrf.mxu1  ;;  %v631_v43 = vmax.f32 %v579_v25, 0.0 }
 0x170   :  { %v581_v27 = vpop.f32.mrf.mxu0  ;;  %v634_v34 = vmax.f32 %v624_v26, 0.0 }
 0x171   :  { %v626_v28 = vpop.f32.mrf.mxu1  ;;  %v632_v41 = vmax.f32 %v581_v27, 0.0 }
 0x172   :  { %v583_v29 = vpop.f32.mrf.mxu0  ;;  %v637_v30 = vmax.f32 %v626_v28, 0.0 }
 0x173   :  { %v628_v31 = vpop.f32.mrf.mxu1  ;;  %v635_v35 = vmax.f32 %v583_v29, 0.0 }
 0x174   :  { %v585_v38 = vpop.f32.mrf.mxu0  ;;  %v638_v39 = vmax.f32 %v628_v31, 0.0  ;;  %v642_v45 = vpack.c.bf16 %v637_v30, %v633_v40 }
 0x175   :  { %v636_v42 = vmax.f32 %v585_v38, 0.0  ;;  %v640_v23 = vpack.c.bf16 %v635_v35, %v631_v43 }
 0x176   :  { %v643_v44 = vpack.c.bf16 %v638_v39, %v634_v34 }
 0x177   :  { %v641_v47 = vpack.c.bf16 %v636_v42, %v632_v41 }
 0x178   :  { %703 = vmatprep.subr.bf16.mxu1 %v643_v44 }
 0x179   :  { %662 = vmatprep.subr.bf16.mxu0 %v641_v47  ;;  %704 = vmatpush1.bf16.msra.mxu1 %v642_v45 }
 0x17a   :  { %663 = vmatpush1.bf16.msra.mxu0 %v640_v23 }
 0x17c   :  { %887 = vmatmul.mubr.msk.bf16.vlgmr.msra.gmra.mxu1 %vm644_vm14, %v639_v48 }
 0x17d   :  { %886 = vmatmul.mubr.msk.bf16.vlgmr.msra.gmra.mxu0 %vm644_vm14, %v639_v48 }
 0x23c   :  { %v723_v54 = vpop.f32.mrf.mxu1 }
 0x23d   :  { %v682_v55 = vpop.f32.mrf.mxu0 }
 0x23e   :  { %v725_v58 = vpop.f32.mrf.mxu1 }
 0x23f   :  { %v684_v59 = vpop.f32.mrf.mxu0  ;;  %v789_v60 = vcombine.low %v723_v54, %v725_v58  ;;  %v822_v61 = vcombine.high %v723_v54, %v725_v58 }
 0x240   :  { %v732_v62 = vcombine.low %v682_v55, %v684_v59  ;;  %v774_v63 = vcombine.high %v682_v55, %v684_v59  ;;  %v727_v0 = vpop.f32.mrf.mxu1 }
 0x241   :  { %v796_v2 = vrot.slane %v789_v60, %v738_v56  ;;  %v813_v3 = vrot.slane %v789_v60, %v758_v57  ;;  %v686_v4 = vpop.f32.mrf.mxu0  ;;  %v829_v36 = vrot.slane %v822_v61, %v758_v57 }
 0x242   :  { %v739_v5 = vrot.slane %v732_v62, %v738_v56  ;;  %v759_v10 = vrot.slane %v732_v62, %v758_v57  ;;  %v728_v7 = vpop.f32.mrf.mxu1  ;;  %v781_v32 = vrot.slane %v774_v63, %v758_v57 }
 0x243   :  { %v803_v8 = vrot.slane %v796_v2, %v738_v56  ;;  %v814_v9 = vcombine.high %v813_v3, %v813_v3  ;;  %v687_v11 = vpop.f32.mrf.mxu0  ;;  %v890_v6 = vrot.slane %v813_v3, 9  ;;  %v831_v18 = vrot.slane %v829_v36, 7 }
 0x244   :  { %v746_v16 = vrot.slane %v739_v5, %v738_v56  ;;  %v760_v12 = vcombine.high %v759_v10, %v759_v10  ;;  %v888_v13 = vrot.slane %v759_v10, 9  ;;  %v783_v22 = vrot.slane %v781_v32, 7 }
 0x245   :  { %889 = vst.msk [vmem:[%s1367_s3 + $0x2] sm:$0x3] %vm750_vm4, %v803_v8  ;;  %v817_v21 = vrot.slane %v814_v9, 7 }
 0x246   :  { %752 = vst.msk [vmem:[%s1367_s3] sm:$0x3] %vm750_vm4, %v746_v16  ;;  %v770_v14 = vrot.slane %v760_v12, 7 }
 0x247   :  { %v818_v15 = vsel %vm1334_vm6, %v890_v6, %v817_v21  ;;  %v830_v17 = vrot.slane %v817_v21, 2 }
 0x248   :  { %v771_v19 = vsel %vm1334_vm6, %v888_v13, %v770_v14  ;;  %v782_v20 = vrot.slane %v770_v14, 2  ;;  %891 = vst [vmem:[%s1368_s4 + $0x4] sm:$0xf] %v818_v15 }
 0x249   :  { %773 = vst [vmem:[%s1368_s4] sm:$0xf] %v771_v19  ;;  %v832_v24 = vsel %vm1334_vm6, %v830_v17, %v831_v18 }
 0x24a   :  { %v784_v33 = vsel %vm1334_vm6, %v782_v20, %v783_v22  ;;  %892 = vst [vmem:[%s1369_s5 + $0x4] sm:$0xf] %v832_v24 }
 0x24b   :  { %786 = vst [vmem:[%s1369_s5] sm:$0xf] %v784_v33 }

</bundles_post_ra>
